<compile_context>
chip_gen: v7x
topology: tpu7x:2x2x1
jax: 0.10.0
libtpu: 0.0.40
codegen_flags: <defaults>
</compile_context>

<pallas_src>
import jax
import jax.numpy as jnp
import numpy as np
from jax import lax
from jax.experimental import pallas as pl
from jax.experimental.pallas import tpu as pltpu


def lstm_kernel(x_ref, wih_ref, whh_t_ref, b_ref, wout_ref, bout_ref,
                out_ref, pred_ref):
    T, I = x_ref.shape
    H = whh_t_ref.shape[0]
    O = wout_ref.shape[0]

    # ---- Hoisted input projection for all timesteps (runs once, off the recurrence).
    if I == 1:
        # (T,1) * (1,4H) broadcast on the VPU -- avoids a depth-1 MXU push/pop.
        pre_gates = x_ref[...] * wih_ref[...] + b_ref[...]        # (T, 4H)
    else:
        pre_gates = (jnp.dot(x_ref[...], wih_ref[...],
                             preferred_element_type=jnp.float32)
                     + b_ref[...])                                # (T, 4H)

    whh_t = whh_t_ref[...]                                        # resident (H, 4H)

    # ---- Recurrence: statically unrolled (T is small & static); h/c stay in vregs.
    h = jnp.zeros((1, H), jnp.float32)
    c = jnp.zeros((1, H), jnp.float32)
    h_rows = []
    for t in range(T):
        gates = (pre_gates[t:t + 1, :]
                 + jnp.dot(h, whh_t,
                           preferred_element_type=jnp.float32))   # (1, 4H)
        sig = jax.nn.sigmoid(gates[:, 0:3 * H])                   # [ i | f | o ]
        g_g = jnp.tanh(gates[:, 3 * H:4 * H])                     # g
        i_g = sig[:, 0:H]
        f_g = sig[:, H:2 * H]
        o_g = sig[:, 2 * H:3 * H]
        c = f_g * c + i_g * g_g
        h = o_g * jnp.tanh(c)
        h_rows.append(h)

    # One consolidated store of all hidden states (instead of T masked partial stores).
    out_ref[...] = jnp.concatenate(h_rows, axis=0)                # (T, H)

    # ---- Linear head on the last hidden state == predictions[-1].
    if O == 1:
        # VPU multiply + lane reduce; avoids a lane-sparse (1,H)@(H,1) MXU dot.
        pred_ref[...] = (jnp.sum(h * wout_ref[...], axis=-1, keepdims=True)
                         + bout_ref[...])                         # (1, 1)
    else:
        pred_ref[...] = (jnp.dot(h, wout_ref[...].T,
                                 preferred_element_type=jnp.float32)
                         + bout_ref[...])                         # (1, O)


def _reorder_gates_ifog(w):
    """Reorder PyTorch gate blocks [i, f, g, o] -> [i, f, o, g] along axis 0."""
    H = w.shape[0] // 4
    return jnp.concatenate(
        [w[0:H], w[H:2 * H], w[3 * H:4 * H], w[2 * H:3 * H]], axis=0)


def lstm_forward(x_seq, W_ih, W_hh, b_ih, b_hh, W_out, b_out):
    """x_seq: (T,) or (T, I). Returns (predictions[-1] of shape (O,), lstm_out (T, H))."""
    x_seq = jnp.asarray(x_seq, jnp.float32)
    if x_seq.ndim == 1:
        x_seq = x_seq[:, None]                                    # (T, I)
    T, I = x_seq.shape
    H = W_hh.shape[1]
    O = W_out.shape[0]

    # Permute weights/bias consistently to the kernel's [i, f, o, g] gate order.
    wih = _reorder_gates_ifog(jnp.asarray(W_ih, jnp.float32)).T   # (I, 4H)
    whh_t = _reorder_gates_ifog(jnp.asarray(W_hh, jnp.float32)).T  # (H, 4H)
    bias = _reorder_gates_ifog(jnp.asarray(b_ih, jnp.float32)
                               + jnp.asarray(b_hh, jnp.float32)).reshape(1, 4 * H)
    wout = jnp.asarray(W_out, jnp.float32)                        # (O, H) -- no transpose
    bout = jnp.asarray(b_out, jnp.float32).reshape(1, O)

    # Grid-less single invocation: all operands are full-array VMEM blocks; no scratch.
    lstm_out, pred = pl.pallas_call(
        lstm_kernel,
        out_shape=(jax.ShapeDtypeStruct((T, H), jnp.float32),
                   jax.ShapeDtypeStruct((1, O), jnp.float32)),
    )(x_seq, wih, whh_t, bias, wout, bout)

    return pred.reshape(O), lstm_out


def lstm_reference(x_seq, W_ih, W_hh, b_ih, b_hh, W_out, b_out):
    """Pure-JAX reference matching torch.nn.LSTM + nn.Linear, predictions[-1]."""
    x_seq = jnp.asarray(x_seq, jnp.float32)
    if x_seq.ndim == 1:
        x_seq = x_seq[:, None]
    H = W_hh.shape[1]

    def step(carry, x_t):
        h, c = carry
        gates = x_t @ W_ih.T + b_ih + h @ W_hh.T + b_hh
        i = jax.nn.sigmoid(gates[0 * H:1 * H])
        f = jax.nn.sigmoid(gates[1 * H:2 * H])
        g = jnp.tanh(gates[2 * H:3 * H])
        o = jax.nn.sigmoid(gates[3 * H:4 * H])
        c_new = f * c + i * g
        h_new = o * jnp.tanh(c_new)
        return (h_new, c_new), h_new

    h0 = jnp.zeros((H,), jnp.float32)
    c0 = jnp.zeros((H,), jnp.float32)
    (_, _), hs = lax.scan(step, (h0, c0), x_seq)
    preds = hs @ W_out.T + b_out
    return preds[-1], hs


if __name__ == "__main__":
    # Small, module-consistent shapes: seq=8, input_size=1, hidden=32, output=1.
    T, I, H, O = 8, 1, 32, 1

    key = jax.random.PRNGKey(0)
    ks = jax.random.split(key, 7)
    scale = 1.0 / np.sqrt(H)  # PyTorch default init range U(-1/sqrt(H), 1/sqrt(H))
    W_ih = jax.random.uniform(ks[0], (4 * H, I), jnp.float32, -scale, scale)
    W_hh = jax.random.uniform(ks[1], (4 * H, H), jnp.float32, -scale, scale)
    b_ih = jax.random.uniform(ks[2], (4 * H,), jnp.float32, -scale, scale)
    b_hh = jax.random.uniform(ks[3], (4 * H,), jnp.float32, -scale, scale)
    W_out = jax.random.uniform(ks[4], (O, H), jnp.float32, -scale, scale)
    b_out = jax.random.uniform(ks[5], (O,), jnp.float32, -scale, scale)

    x_seq = jax.random.normal(ks[6], (T,), jnp.float32)  # 1-D input_seq, like the torch usage

    pred, lstm_out = lstm_forward(x_seq, W_ih, W_hh, b_ih, b_hh, W_out, b_out)
    pred = jax.block_until_ready(pred)
    lstm_out = jax.block_until_ready(lstm_out)

    pred_ref, hs_ref = lstm_reference(x_seq, W_ih, W_hh, b_ih, b_hh, W_out, b_out)

    np.testing.assert_allclose(np.asarray(lstm_out), np.asarray(hs_ref),
                               rtol=1e-5, atol=1e-5)
    np.testing.assert_allclose(np.asarray(pred), np.asarray(pred_ref),
                               rtol=1e-5, atol=1e-5)

    print("KERNEL_OK")
</pallas_src>

<mosaic_0001>
module attributes {stable_mosaic.version = 11 : i64} {
  func.func @lstm_kernel(%arg0: memref<8x1xf32, #tpu.memory_space<vmem>>, %arg1: memref<1x128xf32, #tpu.memory_space<vmem>>, %arg2: memref<32x128xf32, #tpu.memory_space<vmem>>, %arg3: memref<1x128xf32, #tpu.memory_space<vmem>>, %arg4: memref<1x32xf32, #tpu.memory_space<vmem>>, %arg5: memref<1x1xf32, #tpu.memory_space<vmem>>, %arg6: memref<8x32xf32, #tpu.memory_space<vmem>>, %arg7: memref<1x1xf32, #tpu.memory_space<vmem>>) attributes {dimension_semantics = [], scalar_prefetch = 0 : i64, scratch_operands = 0 : i64, tpu.core_type = #tpu.core_type<tc>} {
    %c0 = arith.constant 0 : index
    %c0_0 = arith.constant 0 : index
    %0 = vector.load %arg0[%c0, %c0_0] : memref<8x1xf32, #tpu.memory_space<vmem>>, vector<8x1xf32>
    %c0_1 = arith.constant 0 : index
    %c0_2 = arith.constant 0 : index
    %1 = vector.load %arg1[%c0_1, %c0_2] : memref<1x128xf32, #tpu.memory_space<vmem>>, vector<1x128xf32>
    %2 = vector.broadcast %0 : vector<8x1xf32> to vector<8x128xf32>
    %3 = vector.broadcast %1 : vector<1x128xf32> to vector<8x128xf32>
    %4 = arith.mulf %2, %3 : vector<8x128xf32>
    %c0_3 = arith.constant 0 : index
    %c0_4 = arith.constant 0 : index
    %5 = vector.load %arg3[%c0_3, %c0_4] : memref<1x128xf32, #tpu.memory_space<vmem>>, vector<1x128xf32>
    %6 = vector.broadcast %5 : vector<1x128xf32> to vector<8x128xf32>
    %7 = arith.addf %4, %6 : vector<8x128xf32>
    %c0_5 = arith.constant 0 : index
    %c0_6 = arith.constant 0 : index
    %8 = vector.load %arg2[%c0_5, %c0_6] : memref<32x128xf32, #tpu.memory_space<vmem>>, vector<32x128xf32>
    %cst = arith.constant 0.000000e+00 : f32
    %9 = vector.broadcast %cst : f32 to vector<1x32xf32>
    %cst_7 = arith.constant 0.000000e+00 : f32
    %10 = vector.broadcast %cst_7 : f32 to vector<1x32xf32>
    %11 = vector.extract_strided_slice %7 {offsets = [0, 0], sizes = [1, 128], strides = [1, 1]} : vector<8x128xf32> to vector<1x128xf32>
    %cst_8 = arith.constant dense<0.000000e+00> : vector<1x128xf32>
    %12 = tpu.matmul %9, %8, %cst_8 {dimension_numbers = #tpu.dot_dimension_numbers<[1], [0], [0], [1], [0, 0, 1, 1], [], []>} : vector<1x32xf32>, vector<32x128xf32>, vector<1x128xf32> -> vector<1x128xf32>
    %13 = arith.addf %11, %12 : vector<1x128xf32>
    %14 = vector.extract_strided_slice %13 {offsets = [0, 0], sizes = [1, 96], strides = [1, 1]} : vector<1x128xf32> to vector<1x96xf32>
    %15 = arith.negf %14 : vector<1x96xf32>
    %16 = math.exp %15 : vector<1x96xf32>
    %cst_9 = arith.constant 1.000000e+00 : f32
    %17 = vector.broadcast %cst_9 : f32 to vector<1x96xf32>
    %18 = arith.addf %17, %16 : vector<1x96xf32>
    %19 = arith.divf %17, %18 : vector<1x96xf32>
    %20 = vector.extract_strided_slice %13 {offsets = [0, 96], sizes = [1, 32], strides = [1, 1]} : vector<1x128xf32> to vector<1x32xf32>
    %21 = math.tanh %20 : vector<1x32xf32>
    %22 = vector.extract_strided_slice %19 {offsets = [0, 0], sizes = [1, 32], strides = [1, 1]} : vector<1x96xf32> to vector<1x32xf32>
    %23 = vector.extract_strided_slice %19 {offsets = [0, 32], sizes = [1, 32], strides = [1, 1]} : vector<1x96xf32> to vector<1x32xf32>
    %24 = vector.extract_strided_slice %19 {offsets = [0, 64], sizes = [1, 32], strides = [1, 1]} : vector<1x96xf32> to vector<1x32xf32>
    %25 = arith.mulf %23, %10 : vector<1x32xf32>
    %26 = arith.mulf %22, %21 : vector<1x32xf32>
    %27 = arith.addf %25, %26 : vector<1x32xf32>
    %28 = math.tanh %27 : vector<1x32xf32>
    %29 = arith.mulf %24, %28 : vector<1x32xf32>
    %30 = vector.extract_strided_slice %7 {offsets = [1, 0], sizes = [1, 128], strides = [1, 1]} : vector<8x128xf32> to vector<1x128xf32>
    %cst_10 = arith.constant dense<0.000000e+00> : vector<1x128xf32>
    %31 = tpu.matmul %29, %8, %cst_10 {dimension_numbers = #tpu.dot_dimension_numbers<[1], [0], [0], [1], [0, 0, 1, 1], [], []>} : vector<1x32xf32>, vector<32x128xf32>, vector<1x128xf32> -> vector<1x128xf32>
    %32 = arith.addf %30, %31 : vector<1x128xf32>
    %33 = vector.extract_strided_slice %32 {offsets = [0, 0], sizes = [1, 96], strides = [1, 1]} : vector<1x128xf32> to vector<1x96xf32>
    %34 = arith.negf %33 : vector<1x96xf32>
    %35 = math.exp %34 : vector<1x96xf32>
    %cst_11 = arith.constant 1.000000e+00 : f32
    %36 = vector.broadcast %cst_11 : f32 to vector<1x96xf32>
    %37 = arith.addf %36, %35 : vector<1x96xf32>
    %38 = arith.divf %36, %37 : vector<1x96xf32>
    %39 = vector.extract_strided_slice %32 {offsets = [0, 96], sizes = [1, 32], strides = [1, 1]} : vector<1x128xf32> to vector<1x32xf32>
    %40 = math.tanh %39 : vector<1x32xf32>
    %41 = vector.extract_strided_slice %38 {offsets = [0, 0], sizes = [1, 32], strides = [1, 1]} : vector<1x96xf32> to vector<1x32xf32>
    %42 = vector.extract_strided_slice %38 {offsets = [0, 32], sizes = [1, 32], strides = [1, 1]} : vector<1x96xf32> to vector<1x32xf32>
    %43 = vector.extract_strided_slice %38 {offsets = [0, 64], sizes = [1, 32], strides = [1, 1]} : vector<1x96xf32> to vector<1x32xf32>
    %44 = arith.mulf %42, %27 : vector<1x32xf32>
    %45 = arith.mulf %41, %40 : vector<1x32xf32>
    %46 = arith.addf %44, %45 : vector<1x32xf32>
    %47 = math.tanh %46 : vector<1x32xf32>
    %48 = arith.mulf %43, %47 : vector<1x32xf32>
    %49 = vector.extract_strided_slice %7 {offsets = [2, 0], sizes = [1, 128], strides = [1, 1]} : vector<8x128xf32> to vector<1x128xf32>
    %cst_12 = arith.constant dense<0.000000e+00> : vector<1x128xf32>
    %50 = tpu.matmul %48, %8, %cst_12 {dimension_numbers = #tpu.dot_dimension_numbers<[1], [0], [0], [1], [0, 0, 1, 1], [], []>} : vector<1x32xf32>, vector<32x128xf32>, vector<1x128xf32> -> vector<1x128xf32>
    %51 = arith.addf %49, %50 : vector<1x128xf32>
    %52 = vector.extract_strided_slice %51 {offsets = [0, 0], sizes = [1, 96], strides = [1, 1]} : vector<1x128xf32> to vector<1x96xf32>
    %53 = arith.negf %52 : vector<1x96xf32>
    %54 = math.exp %53 : vector<1x96xf32>
    %cst_13 = arith.constant 1.000000e+00 : f32
    %55 = vector.broadcast %cst_13 : f32 to vector<1x96xf32>
    %56 = arith.addf %55, %54 : vector<1x96xf32>
    %57 = arith.divf %55, %56 : vector<1x96xf32>
    %58 = vector.extract_strided_slice %51 {offsets = [0, 96], sizes = [1, 32], strides = [1, 1]} : vector<1x128xf32> to vector<1x32xf32>
    %59 = math.tanh %58 : vector<1x32xf32>
    %60 = vector.extract_strided_slice %57 {offsets = [0, 0], sizes = [1, 32], strides = [1, 1]} : vector<1x96xf32> to vector<1x32xf32>
    %61 = vector.extract_strided_slice %57 {offsets = [0, 32], sizes = [1, 32], strides = [1, 1]} : vector<1x96xf32> to vector<1x32xf32>
    %62 = vector.extract_strided_slice %57 {offsets = [0, 64], sizes = [1, 32], strides = [1, 1]} : vector<1x96xf32> to vector<1x32xf32>
    %63 = arith.mulf %61, %46 : vector<1x32xf32>
    %64 = arith.mulf %60, %59 : vector<1x32xf32>
    %65 = arith.addf %63, %64 : vector<1x32xf32>
    %66 = math.tanh %65 : vector<1x32xf32>
    %67 = arith.mulf %62, %66 : vector<1x32xf32>
    %68 = vector.extract_strided_slice %7 {offsets = [3, 0], sizes = [1, 128], strides = [1, 1]} : vector<8x128xf32> to vector<1x128xf32>
    %cst_14 = arith.constant dense<0.000000e+00> : vector<1x128xf32>
    %69 = tpu.matmul %67, %8, %cst_14 {dimension_numbers = #tpu.dot_dimension_numbers<[1], [0], [0], [1], [0, 0, 1, 1], [], []>} : vector<1x32xf32>, vector<32x128xf32>, vector<1x128xf32> -> vector<1x128xf32>
    %70 = arith.addf %68, %69 : vector<1x128xf32>
    %71 = vector.extract_strided_slice %70 {offsets = [0, 0], sizes = [1, 96], strides = [1, 1]} : vector<1x128xf32> to vector<1x96xf32>
    %72 = arith.negf %71 : vector<1x96xf32>
    %73 = math.exp %72 : vector<1x96xf32>
    %cst_15 = arith.constant 1.000000e+00 : f32
    %74 = vector.broadcast %cst_15 : f32 to vector<1x96xf32>
    %75 = arith.addf %74, %73 : vector<1x96xf32>
    %76 = arith.divf %74, %75 : vector<1x96xf32>
    %77 = vector.extract_strided_slice %70 {offsets = [0, 96], sizes = [1, 32], strides = [1, 1]} : vector<1x128xf32> to vector<1x32xf32>
    %78 = math.tanh %77 : vector<1x32xf32>
    %79 = vector.extract_strided_slice %76 {offsets = [0, 0], sizes = [1, 32], strides = [1, 1]} : vector<1x96xf32> to vector<1x32xf32>
    %80 = vector.extract_strided_slice %76 {offsets = [0, 32], sizes = [1, 32], strides = [1, 1]} : vector<1x96xf32> to vector<1x32xf32>
    %81 = vector.extract_strided_slice %76 {offsets = [0, 64], sizes = [1, 32], strides = [1, 1]} : vector<1x96xf32> to vector<1x32xf32>
    %82 = arith.mulf %80, %65 : vector<1x32xf32>
    %83 = arith.mulf %79, %78 : vector<1x32xf32>
    %84 = arith.addf %82, %83 : vector<1x32xf32>
    %85 = math.tanh %84 : vector<1x32xf32>
    %86 = arith.mulf %81, %85 : vector<1x32xf32>
    %87 = vector.extract_strided_slice %7 {offsets = [4, 0], sizes = [1, 128], strides = [1, 1]} : vector<8x128xf32> to vector<1x128xf32>
    %cst_16 = arith.constant dense<0.000000e+00> : vector<1x128xf32>
    %88 = tpu.matmul %86, %8, %cst_16 {dimension_numbers = #tpu.dot_dimension_numbers<[1], [0], [0], [1], [0, 0, 1, 1], [], []>} : vector<1x32xf32>, vector<32x128xf32>, vector<1x128xf32> -> vector<1x128xf32>
    %89 = arith.addf %87, %88 : vector<1x128xf32>
    %90 = vector.extract_strided_slice %89 {offsets = [0, 0], sizes = [1, 96], strides = [1, 1]} : vector<1x128xf32> to vector<1x96xf32>
    %91 = arith.negf %90 : vector<1x96xf32>
    %92 = math.exp %91 : vector<1x96xf32>
    %cst_17 = arith.constant 1.000000e+00 : f32
    %93 = vector.broadcast %cst_17 : f32 to vector<1x96xf32>
    %94 = arith.addf %93, %92 : vector<1x96xf32>
    %95 = arith.divf %93, %94 : vector<1x96xf32>
    %96 = vector.extract_strided_slice %89 {offsets = [0, 96], sizes = [1, 32], strides = [1, 1]} : vector<1x128xf32> to vector<1x32xf32>
    %97 = math.tanh %96 : vector<1x32xf32>
    %98 = vector.extract_strided_slice %95 {offsets = [0, 0], sizes = [1, 32], strides = [1, 1]} : vector<1x96xf32> to vector<1x32xf32>
    %99 = vector.extract_strided_slice %95 {offsets = [0, 32], sizes = [1, 32], strides = [1, 1]} : vector<1x96xf32> to vector<1x32xf32>
    %100 = vector.extract_strided_slice %95 {offsets = [0, 64], sizes = [1, 32], strides = [1, 1]} : vector<1x96xf32> to vector<1x32xf32>
    %101 = arith.mulf %99, %84 : vector<1x32xf32>
    %102 = arith.mulf %98, %97 : vector<1x32xf32>
    %103 = arith.addf %101, %102 : vector<1x32xf32>
    %104 = math.tanh %103 : vector<1x32xf32>
    %105 = arith.mulf %100, %104 : vector<1x32xf32>
    %106 = vector.extract_strided_slice %7 {offsets = [5, 0], sizes = [1, 128], strides = [1, 1]} : vector<8x128xf32> to vector<1x128xf32>
    %cst_18 = arith.constant dense<0.000000e+00> : vector<1x128xf32>
    %107 = tpu.matmul %105, %8, %cst_18 {dimension_numbers = #tpu.dot_dimension_numbers<[1], [0], [0], [1], [0, 0, 1, 1], [], []>} : vector<1x32xf32>, vector<32x128xf32>, vector<1x128xf32> -> vector<1x128xf32>
    %108 = arith.addf %106, %107 : vector<1x128xf32>
    %109 = vector.extract_strided_slice %108 {offsets = [0, 0], sizes = [1, 96], strides = [1, 1]} : vector<1x128xf32> to vector<1x96xf32>
    %110 = arith.negf %109 : vector<1x96xf32>
    %111 = math.exp %110 : vector<1x96xf32>
    %cst_19 = arith.constant 1.000000e+00 : f32
    %112 = vector.broadcast %cst_19 : f32 to vector<1x96xf32>
    %113 = arith.addf %112, %111 : vector<1x96xf32>
    %114 = arith.divf %112, %113 : vector<1x96xf32>
    %115 = vector.extract_strided_slice %108 {offsets = [0, 96], sizes = [1, 32], strides = [1, 1]} : vector<1x128xf32> to vector<1x32xf32>
    %116 = math.tanh %115 : vector<1x32xf32>
    %117 = vector.extract_strided_slice %114 {offsets = [0, 0], sizes = [1, 32], strides = [1, 1]} : vector<1x96xf32> to vector<1x32xf32>
    %118 = vector.extract_strided_slice %114 {offsets = [0, 32], sizes = [1, 32], strides = [1, 1]} : vector<1x96xf32> to vector<1x32xf32>
    %119 = vector.extract_strided_slice %114 {offsets = [0, 64], sizes = [1, 32], strides = [1, 1]} : vector<1x96xf32> to vector<1x32xf32>
    %120 = arith.mulf %118, %103 : vector<1x32xf32>
    %121 = arith.mulf %117, %116 : vector<1x32xf32>
    %122 = arith.addf %120, %121 : vector<1x32xf32>
    %123 = math.tanh %122 : vector<1x32xf32>
    %124 = arith.mulf %119, %123 : vector<1x32xf32>
    %125 = vector.extract_strided_slice %7 {offsets = [6, 0], sizes = [1, 128], strides = [1, 1]} : vector<8x128xf32> to vector<1x128xf32>
    %cst_20 = arith.constant dense<0.000000e+00> : vector<1x128xf32>
    %126 = tpu.matmul %124, %8, %cst_20 {dimension_numbers = #tpu.dot_dimension_numbers<[1], [0], [0], [1], [0, 0, 1, 1], [], []>} : vector<1x32xf32>, vector<32x128xf32>, vector<1x128xf32> -> vector<1x128xf32>
    %127 = arith.addf %125, %126 : vector<1x128xf32>
    %128 = vector.extract_strided_slice %127 {offsets = [0, 0], sizes = [1, 96], strides = [1, 1]} : vector<1x128xf32> to vector<1x96xf32>
    %129 = arith.negf %128 : vector<1x96xf32>
    %130 = math.exp %129 : vector<1x96xf32>
    %cst_21 = arith.constant 1.000000e+00 : f32
    %131 = vector.broadcast %cst_21 : f32 to vector<1x96xf32>
    %132 = arith.addf %131, %130 : vector<1x96xf32>
    %133 = arith.divf %131, %132 : vector<1x96xf32>
    %134 = vector.extract_strided_slice %127 {offsets = [0, 96], sizes = [1, 32], strides = [1, 1]} : vector<1x128xf32> to vector<1x32xf32>
    %135 = math.tanh %134 : vector<1x32xf32>
    %136 = vector.extract_strided_slice %133 {offsets = [0, 0], sizes = [1, 32], strides = [1, 1]} : vector<1x96xf32> to vector<1x32xf32>
    %137 = vector.extract_strided_slice %133 {offsets = [0, 32], sizes = [1, 32], strides = [1, 1]} : vector<1x96xf32> to vector<1x32xf32>
    %138 = vector.extract_strided_slice %133 {offsets = [0, 64], sizes = [1, 32], strides = [1, 1]} : vector<1x96xf32> to vector<1x32xf32>
    %139 = arith.mulf %137, %122 : vector<1x32xf32>
    %140 = arith.mulf %136, %135 : vector<1x32xf32>
    %141 = arith.addf %139, %140 : vector<1x32xf32>
    %142 = math.tanh %141 : vector<1x32xf32>
    %143 = arith.mulf %138, %142 : vector<1x32xf32>
    %144 = vector.extract_strided_slice %7 {offsets = [7, 0], sizes = [1, 128], strides = [1, 1]} : vector<8x128xf32> to vector<1x128xf32>
    %cst_22 = arith.constant dense<0.000000e+00> : vector<1x128xf32>
    %145 = tpu.matmul %143, %8, %cst_22 {dimension_numbers = #tpu.dot_dimension_numbers<[1], [0], [0], [1], [0, 0, 1, 1], [], []>} : vector<1x32xf32>, vector<32x128xf32>, vector<1x128xf32> -> vector<1x128xf32>
    %146 = arith.addf %144, %145 : vector<1x128xf32>
    %147 = vector.extract_strided_slice %146 {offsets = [0, 0], sizes = [1, 96], strides = [1, 1]} : vector<1x128xf32> to vector<1x96xf32>
    %148 = arith.negf %147 : vector<1x96xf32>
    %149 = math.exp %148 : vector<1x96xf32>
    %cst_23 = arith.constant 1.000000e+00 : f32
    %150 = vector.broadcast %cst_23 : f32 to vector<1x96xf32>
    %151 = arith.addf %150, %149 : vector<1x96xf32>
    %152 = arith.divf %150, %151 : vector<1x96xf32>
    %153 = vector.extract_strided_slice %146 {offsets = [0, 96], sizes = [1, 32], strides = [1, 1]} : vector<1x128xf32> to vector<1x32xf32>
    %154 = math.tanh %153 : vector<1x32xf32>
    %155 = vector.extract_strided_slice %152 {offsets = [0, 0], sizes = [1, 32], strides = [1, 1]} : vector<1x96xf32> to vector<1x32xf32>
    %156 = vector.extract_strided_slice %152 {offsets = [0, 32], sizes = [1, 32], strides = [1, 1]} : vector<1x96xf32> to vector<1x32xf32>
    %157 = vector.extract_strided_slice %152 {offsets = [0, 64], sizes = [1, 32], strides = [1, 1]} : vector<1x96xf32> to vector<1x32xf32>
    %158 = arith.mulf %156, %141 : vector<1x32xf32>
    %159 = arith.mulf %155, %154 : vector<1x32xf32>
    %160 = arith.addf %158, %159 : vector<1x32xf32>
    %161 = math.tanh %160 : vector<1x32xf32>
    %162 = arith.mulf %157, %161 : vector<1x32xf32>
    %163 = tpu.concatenate %29, %48, %67, %86, %105, %124, %143, %162 in 0 : vector<1x32xf32>, vector<1x32xf32>, vector<1x32xf32>, vector<1x32xf32>, vector<1x32xf32>, vector<1x32xf32>, vector<1x32xf32>, vector<1x32xf32> -> vector<8x32xf32>
    %c0_24 = arith.constant 0 : index
    %c0_25 = arith.constant 0 : index
    %164 = vector.load %arg6[%c0_24, %c0_25] : memref<8x32xf32, #tpu.memory_space<vmem>>, vector<8x32xf32>
    tpu.vector_store %arg6[%c0_24, %c0_25], %163 {strides = array<i32>} : memref<8x32xf32, #tpu.memory_space<vmem>>, vector<8x32xf32>,
    %c0_26 = arith.constant 0 : index
    %c0_27 = arith.constant 0 : index
    %165 = vector.load %arg4[%c0_26, %c0_27] : memref<1x32xf32, #tpu.memory_space<vmem>>, vector<1x32xf32>
    %166 = arith.mulf %162, %165 : vector<1x32xf32>
    %cst_28 = arith.constant dense<0.000000e+00> : vector<1xf32>
    %167 = vector.multi_reduction <add>, %166, %cst_28 [1] : vector<1x32xf32> to vector<1xf32>
    %168 = vector.shape_cast %167 : vector<1xf32> to vector<1x1xf32>
    %c0_29 = arith.constant 0 : index
    %c0_30 = arith.constant 0 : index
    %169 = vector.load %arg5[%c0_29, %c0_30] : memref<1x1xf32, #tpu.memory_space<vmem>>, vector<1x1xf32>
    %170 = arith.addf %168, %169 : vector<1x1xf32>
    %c0_31 = arith.constant 0 : index
    %c0_32 = arith.constant 0 : index
    %171 = vector.load %arg7[%c0_31, %c0_32] : memref<1x1xf32, #tpu.memory_space<vmem>>, vector<1x1xf32>
    tpu.vector_store %arg7[%c0_31, %c0_32], %170 {strides = array<i32>} : memref<1x1xf32, #tpu.memory_space<vmem>>, vector<1x1xf32>,
    return
  }
}

</mosaic_0001>

<bundles_post_ra>
// kernel: tpu_custom_call.1
= control target key start
LH: loop header
LB: loop body
LE: loop exit
PB: predicated region body
PF: predicated region fallthrough
CT: control target
= control target key end

     0   :  { %s1546_s0 = inlined_call_operand.vmem [shape: f32[8,1], index: 0, kind: input, shape index: {}]   ;;  %s1547_s1 = inlined_call_operand.vmem [shape: f32[1,128], index: 1, kind: input, shape index: {}]   ;;  %s1548_s2 = inlined_call_operand.hbm [shape: f32[32,128], index: 2, kind: input, shape index: {}]   ;;  %s1549_s3 = inlined_call_operand.vmem [shape: f32[1,128], index: 3, kind: input, shape index: {}]   ;;  %s1550_s4 = inlined_call_operand.vmem [shape: f32[1,32], index: 4, kind: input, shape index: {}]   ;;  %s1551_s5 = inlined_call_operand.<no memory space> [shape: f32[1,1], index: 5, kind: input, shape index: {}]   ;;  %s1552_s6 = inlined_call_operand.hbm [shape: f32[8,32], index: 6, kind: output, shape index: {0}]   ;;  %s1553_s7 = inlined_call_operand.hbm [shape: f32[1,1], index: 7, kind: output, shape index: {1}]  }
   0x1   :  { %v13_v0 = vstv %s1551_s5 }
   0x2   :  { %14 = vst [vmem:[#allocation2] sm:$0x1] %v13_v0 }
   0x3   :  { %15 = vsyncpa [#allocation4], 0 }
   0x4   :  { %16 = vsyncpa [#allocation5], 0 }
   0x5   :  { %17 = vsyncpa [#allocation8], 0  ;;  %s1335_s26 = smov [#allocation3]   ;;  %s1263_s30 = scalar_lea.hbm %s1548_s2, 512 }
   0x6   :  { %s27_s27 = sshll.u32 %s1335_s26, 4  ;;  %p1264_p0 = scmp.ne.s32.totalorder %s1548_s2, %s1263_s30  ;;  %s28_s27 = int_to_ptr.vmem [resolvable:$true] %s27_s27 }
   0x7   :  { %p1267_p1 = scmp.lt.u32.totalorder %s1263_s30, %s1548_s2 }
   0x9   :  { %p1269_p2 = pnand %p1267_p1, %p1264_p0 }
   0xb   :  { %1272 = shalt.err (!%p1269_p2)
}
   0xc   :  { %s1273_s5 = scalar_lea.vmem %s28_s27, 512  ;;  %p1278_p4 = scmp.lt.s32.totalorder %s28_s27, %s28_s27 }
   0xd   :  { %p1274_p3 = scmp.ne.s32.totalorder %s28_s27, %s1273_s5  ;;  %p1279_p5 = scmp.lt.s32.totalorder %s1273_s5, %s1273_s5 }
   0xf   :  { %p1280_p6 = por %p1279_p5, %p1278_p4 }
  0x11   :  { %p1281_p7 = pnand %p1280_p6, %p1274_p3 }
  0x13   :  { %1284 = shalt.err (!%p1281_p7)
}
  0x14   :  { %s1336_s12 = smov 128   ;;  %s1337_s13 = smov 8  }
  0x15   :  { %33 = dma.hbm_to_vmem [thread:$0]  %s1548_s2, 512, %s28_s27, [#allocation4], %s1336_s12, %s1336_s12, %s1337_s13  }
  0x16   :  { %1329 = dma.done.wait [#allocation4], 512  }
  0x17   :  { %1330 = vsyncadd [#allocation4], 4294966784  ;;  %v1338_v1 = vmov 0.0|0.0   ;;  %vm1339_vm0 = vmmov 0   ;;  %v1340_v2 = vmov 0.0   ;;  %v1341_v3 = vmov 0  }
  0x18   :  { %1139 = vmatprep.subr.bf16.mxu0 %v1338_v1  ;;  %1059 = vmatprep.mubr.msk.f32.mxu0 %vm1339_vm0, %v1340_v2  ;;  %v65_v4 = vld [vmem:[#allocation3] sm:$0xff]  ;;  %v66_v5 = vld [vmem:[#allocation3 + $0x8] sm:$0xff]  ;;  %v67_v6 = vld [vmem:[#allocation3 + $0x10] sm:$0xff]  ;;  %s1342_s20 = smov 32   ;;  %vm69_vm1 = vcmask 261120   ;;  %vm916_vm2 = vcmask 1040384  }
  0x19   :  { %1198 = vset.pattern.permute.xlu0 %v1341_v3  ;;  %1145 = vmatprep.subr.bf16.mxu1 %v1338_v1  ;;  %v1407_v7 = vpack.c.bf16 %v66_v5, %v65_v4  ;;  %v68_v8 = vld [vmem:[#allocation3 + $0x18] sm:$0xff]  ;;  %vm918_vm3 = vcmask 1041408   ;;  %vm920_vm4 = vcmask 1042432   ;;  %vm922_vm5 = vcmask 1043456  }
  0x1a   :  { %1070 = vmatprep.mubr.msk.f32.mxu1 %vm1339_vm0, %v1340_v2  ;;  %v43_v9 = vld [vmem:[%s1546_s0] sm:$0xff]  ;;  %v1413_v10 = vpack.c.bf16 %v68_v8, %v67_v6  ;;  %vm924_vm6 = vcmask 1044480   ;;  %vm926_vm7 = vcmask 1045504   ;;  %vm928_vm8 = vcmask 1046528  }
  0x1b   :  { %47 = vperm.xlu0 %1198, %v43_v9   ;;  %1141 = vmatpush3.bf16.msra.mxu0 %v1407_v7  ;;  %v992_v11 = vld [vmem:[%s1547_s1] ss:$0 sm:$0xff]  ;;  %s1343_s1 = smov 64   ;;  %vm949_vm9 = vcmask 261127  }
  0x1c   :  { %1147 = vmatpush3.bf16.msra.mxu1 %v1407_v7  ;;  %1142 = vmatprep.subr.bf16.mxu0 %v1338_v1  ;;  %v993_v14 = vld [vmem:[%s1549_s3] ss:$0 sm:$0xff] }
  0x1d   :  { %1148 = vmatprep.subr.bf16.mxu1 %v1338_v1 }
  0x1f   :  { %1144 = vmatpush3.bf16.msra.mxu0 %v1413_v10 }
  0x20   :  { %1150 = vmatpush3.bf16.msra.mxu1 %v1413_v10  ;;  %1151 = vmatprep.subr.bf16.mxu0 %v1338_v1 }
  0x21   :  { %1157 = vmatprep.subr.bf16.mxu1 %v1338_v1 }
  0x22   :  { %1060 = vmatmul.mubr.f32.vlgmr.msra.gmra.mrb[0].mxu0 %v1340_v2 }
  0x23   :  { %1153 = vmatpush3.bf16.msra.mxu0 %v1407_v7  ;;  %1081 = vmatprep.mubr.msk.f32.mxu0 %vm1339_vm0, %v1340_v2 }
  0x24   :  { %1154 = vmatprep.subr.bf16.mxu0 %v1338_v1 }
  0x27   :  { %1156 = vmatpush3.bf16.msra.mxu0 %v1413_v10 }
  0x28   :  { %1163 = vmatprep.subr.bf16.mxu0 %v1338_v1 }
  0x9a   :  { %v48_v12 = vpop.permute.xlu0 %47 }
  0x9b   :  { %v56_v13 = vmul.f32 %v992_v11, %v48_v12 }
  0x9d   :  { %v1435_v15 = vadd.f32 %v993_v14, %v56_v13 }
  0xf5   :  { %v139_v16 = vpop.f32.mrb[0].mxu0 }
  0xf6   :  { %v143_v17 = vadd.f32 %v139_v16, %v1435_v15  ;;  %v1061_v18 = vpop.f32.mrb[1].mxu0 }
  0xf8   :  { %1199 = vtanh.f32 %v143_v17  ;;  %v994_v20 = vmul.f32 -1.442695, %v143_v17 }
  0xfa   :  { %1201 = vpow2.f32 %v994_v20 }
 0x102   :  { %v1200_v19 = vpop.eup %1199 }
 0x103   :  { %153 = vrot.lane.b32.xlu0 %v1200_v19, %s1342_s20 }
 0x104   :  { %v1202_v21 = vpop.eup %1201 }
 0x105   :  { %v147_v22 = vadd.f32 1.0, %v1202_v21 }
 0x107   :  { %1203 = vrcp.f32 %v147_v22 }
 0x111   :  { %v1204_v23 = vpop.eup %1203 }
 0x112   :  { %v151_v26 = vmul.f32 0.0, %v1204_v23 }
 0x175   :  { %v154_v24 = vpop.permute.xlu0 %153 }
 0x176   :  { %v156_v25 = vmul.f32 %v1204_v23, %v154_v24 }
 0x178   :  { %158 = vrot.lane.b32.xlu1 %v156_v25, %s1342_s20 }
 0x1ea   :  { %v159_v27 = vpop.permute.xlu1 %158 }
 0x1eb   :  { %v161_v28 = vadd.f32 %v159_v27, %v151_v26 }
 0x1ed   :  { %1205 = vtanh.f32 %v161_v28  ;;  %v255_v44 = vrot.slane %v161_v28, 7 }
 0x1f7   :  { %v1206_v29 = vpop.eup %1205 }
 0x1f8   :  { %164 = vrot.lane.b32.xlu1 %v1206_v29, %s1342_s20 }
 0x26a   :  { %v165_v30 = vpop.permute.xlu1 %164 }
 0x26b   :  { %v1441_v31 = vmul.f32 %v1204_v23, %v165_v30 }
 0x26d   :  { %169 = vrot.lane.b32.xlu0 %v1441_v31, %s1343_s1 }
 0x2df   :  { %v170_v32 = vpop.permute.xlu0 %169 }
 0x2e0   :  { %1071 = vmatmul.mubr.msk.f32.vlgmr.msra.gmra.mrb[0].mxu1 %vm69_vm1, %v170_v32 }
 0x2e1   :  { %1159 = vmatpush3.bf16.msra.mxu1 %v1407_v7  ;;  %1092 = vmatprep.mubr.msk.f32.mxu1 %vm1339_vm0, %v1340_v2 }
 0x2e2   :  { %1160 = vmatprep.subr.bf16.mxu1 %v1338_v1 }
 0x2e5   :  { %1162 = vmatpush3.bf16.msra.mxu1 %v1413_v10 }
 0x2e6   :  { %1169 = vmatprep.subr.bf16.mxu1 %v1338_v1 }
 0x3b3   :  { %v239_v33 = vpop.f32.mrb[0].mxu1 }
 0x3b4   :  { %v244_v34 = vrot.slane %v239_v33, 7  ;;  %v1072_v35 = vpop.f32.mrb[1].mxu1 }
 0x3b6   :  { %v246_v36 = vadd.f32 %v244_v34, %v1435_v15 }
 0x3b8   :  { %1207 = vtanh.f32 %v246_v36  ;;  %v996_v38 = vmul.f32 -1.442695, %v246_v36 }
 0x3ba   :  { %1209 = vpow2.f32 %v996_v38 }
 0x3c2   :  { %v1208_v37 = vpop.eup %1207 }
 0x3c3   :  { %259 = vrot.lane.b32.xlu1 %v1208_v37, %s1342_s20 }
 0x3c4   :  { %v1210_v39 = vpop.eup %1209 }
 0x3c5   :  { %v250_v40 = vadd.f32 1.0, %v1210_v39 }
 0x3c7   :  { %1211 = vrcp.f32 %v250_v40 }
 0x3d1   :  { %v1212_v41 = vpop.eup %1211 }
 0x3d2   :  { %v257_v45 = vmul.f32 %v1212_v41, %v255_v44 }
 0x435   :  { %v260_v42 = vpop.permute.xlu1 %259 }
 0x436   :  { %v262_v43 = vmul.f32 %v1212_v41, %v260_v42 }
 0x438   :  { %264 = vrot.lane.b32.xlu0 %v262_v43, %s1342_s20 }
 0x4aa   :  { %v265_v46 = vpop.permute.xlu0 %264 }
 0x4ab   :  { %v267_v47 = vadd.f32 %v265_v46, %v257_v45 }
 0x4ad   :  { %1213 = vtanh.f32 %v267_v47  ;;  %v362_v0 = vrot.slane %v267_v47, 7 }
 0x4b7   :  { %v1214_v48 = vpop.eup %1213 }
 0x4b8   :  { %270 = vrot.lane.b32.xlu1 %v1214_v48, %s1342_s20 }
 0x52a   :  { %v271_v49 = vpop.permute.xlu1 %270 }
 0x52b   :  { %v273_v50 = vmul.f32 %v1212_v41, %v271_v49 }
 0x52d   :  { %v275_v51 = vrot.slane %v273_v50, 1  ;;  %v917_v11 = vsel %vm916_vm2, %v1441_v31, %v273_v50 }
 0x52f   :  { %276 = vrot.lane.b32.xlu0 %v275_v51, %s1343_s1 }
 0x5a1   :  { %v277_v52 = vpop.permute.xlu0 %276 }
 0x5a2   :  { %1082 = vmatmul.mubr.msk.f32.vlgmr.msra.gmra.mrb[2].mxu0 %vm69_vm1, %v277_v52 }
 0x5a3   :  { %1165 = vmatpush3.bf16.msra.mxu0 %v1407_v7  ;;  %1103 = vmatprep.mubr.msk.f32.mxu0 %vm1339_vm0, %v1340_v2 }
 0x5a4   :  { %1166 = vmatprep.subr.bf16.mxu0 %v1338_v1 }
 0x5a7   :  { %1168 = vmatpush3.bf16.msra.mxu0 %v1413_v10 }
 0x5a8   :  { %1175 = vmatprep.subr.bf16.mxu0 %v1338_v1 }
 0x675   :  { %v346_v53 = vpop.f32.mrb[2].mxu0 }
 0x676   :  { %v351_v54 = vrot.slane %v346_v53, 6  ;;  %v1083_v55 = vpop.f32.mrb[3].mxu0 }
 0x678   :  { %v353_v56 = vadd.f32 %v351_v54, %v1435_v15 }
 0x67a   :  { %1215 = vtanh.f32 %v353_v56  ;;  %v998_v58 = vmul.f32 -1.442695, %v353_v56 }
 0x67c   :  { %1217 = vpow2.f32 %v998_v58 }
 0x684   :  { %v1216_v57 = vpop.eup %1215 }
 0x685   :  { %366 = vrot.lane.b32.xlu1 %v1216_v57, %s1342_s20 }
 0x686   :  { %v1218_v59 = vpop.eup %1217 }
 0x687   :  { %v357_v60 = vadd.f32 1.0, %v1218_v59 }
 0x689   :  { %1219 = vrcp.f32 %v357_v60 }
 0x693   :  { %v1220_v61 = vpop.eup %1219 }
 0x694   :  { %v364_v3 = vmul.f32 %v1220_v61, %v362_v0 }
 0x6f7   :  { %v367_v62 = vpop.permute.xlu1 %366 }
 0x6f8   :  { %v369_v63 = vmul.f32 %v1220_v61, %v367_v62 }
 0x6fa   :  { %371 = vrot.lane.b32.xlu0 %v369_v63, %s1342_s20 }
 0x76c   :  { %v372_v4 = vpop.permute.xlu0 %371 }
 0x76d   :  { %v374_v5 = vadd.f32 %v372_v4, %v364_v3 }
 0x76f   :  { %1221 = vtanh.f32 %v374_v5  ;;  %v469_v27 = vrot.slane %v374_v5, 7 }
 0x779   :  { %v1222_v6 = vpop.eup %1221 }
 0x77a   :  { %377 = vrot.lane.b32.xlu1 %v1222_v6, %s1342_s20 }
 0x7ec   :  { %v378_v8 = vpop.permute.xlu1 %377 }
 0x7ed   :  { %v380_v9 = vmul.f32 %v1220_v61, %v378_v8 }
 0x7ef   :  { %v382_v12 = vrot.slane %v380_v9, 2  ;;  %v919_v13 = vsel %vm918_vm3, %v917_v11, %v380_v9 }
 0x7f1   :  { %383 = vrot.lane.b32.xlu0 %v382_v12, %s1343_s1 }
 0x863   :  { %v384_v14 = vpop.permute.xlu0 %383 }
 0x864   :  { %1093 = vmatmul.mubr.msk.f32.vlgmr.msra.gmra.mrb[2].mxu1 %vm69_vm1, %v384_v14 }
 0x865   :  { %1171 = vmatpush3.bf16.msra.mxu1 %v1407_v7  ;;  %1114 = vmatprep.mubr.msk.f32.mxu1 %vm1339_vm0, %v1340_v2 }
 0x866   :  { %1172 = vmatprep.subr.bf16.mxu1 %v1338_v1 }
 0x869   :  { %1174 = vmatpush3.bf16.msra.mxu1 %v1413_v10 }
 0x86a   :  { %1181 = vmatprep.subr.bf16.mxu1 %v1338_v1 }
 0x937   :  { %v453_v16 = vpop.f32.mrb[2].mxu1 }
 0x938   :  { %v458_v17 = vrot.slane %v453_v16, 5  ;;  %v1094_v18 = vpop.f32.mrb[3].mxu1 }
 0x93a   :  { %v460_v19 = vadd.f32 %v458_v17, %v1435_v15 }
 0x93c   :  { %1223 = vtanh.f32 %v460_v19  ;;  %v1000_v21 = vmul.f32 -1.442695, %v460_v19 }
 0x93e   :  { %1225 = vpow2.f32 %v1000_v21 }
 0x946   :  { %v1224_v20 = vpop.eup %1223 }
 0x947   :  { %473 = vrot.lane.b32.xlu1 %v1224_v20, %s1342_s20 }
 0x948   :  { %v1226_v22 = vpop.eup %1225 }
 0x949   :  { %v464_v23 = vadd.f32 1.0, %v1226_v22 }
 0x94b   :  { %1227 = vrcp.f32 %v464_v23 }
 0x955   :  { %v1228_v24 = vpop.eup %1227 }
 0x956   :  { %v471_v28 = vmul.f32 %v1228_v24, %v469_v27 }
 0x9b9   :  { %v474_v25 = vpop.permute.xlu1 %473 }
 0x9ba   :  { %v476_v26 = vmul.f32 %v1228_v24, %v474_v25 }
 0x9bc   :  { %478 = vrot.lane.b32.xlu0 %v476_v26, %s1342_s20 }
 0xa2e   :  { %v479_v29 = vpop.permute.xlu0 %478 }
 0xa2f   :  { %v481_v30 = vadd.f32 %v479_v29, %v471_v28 }
 0xa31   :  { %1229 = vtanh.f32 %v481_v30  ;;  %v576_v48 = vrot.slane %v481_v30, 7 }
 0xa3b   :  { %v1230_v31 = vpop.eup %1229 }
 0xa3c   :  { %484 = vrot.lane.b32.xlu1 %v1230_v31, %s1342_s20 }
 0xaae   :  { %v485_v32 = vpop.permute.xlu1 %484 }
 0xaaf   :  { %v487_v33 = vmul.f32 %v1228_v24, %v485_v32 }
 0xab1   :  { %v489_v34 = vrot.slane %v487_v33, 3  ;;  %v921_v35 = vsel %vm920_vm4, %v919_v13, %v487_v33 }
 0xab3   :  { %490 = vrot.lane.b32.xlu0 %v489_v34, %s1343_s1 }
 0xb25   :  { %v491_v36 = vpop.permute.xlu0 %490 }
 0xb26   :  { %1104 = vmatmul.mubr.msk.f32.vlgmr.msra.gmra.mrb[4].mxu0 %vm69_vm1, %v491_v36 }
 0xb27   :  { %1177 = vmatpush3.bf16.msra.mxu0 %v1407_v7  ;;  %1125 = vmatprep.mubr.msk.f32.mxu0 %vm1339_vm0, %v1340_v2 }
 0xb28   :  { %1178 = vmatprep.subr.bf16.mxu0 %v1338_v1 }
 0xb2b   :  { %1180 = vmatpush3.bf16.msra.mxu0 %v1413_v10 }
 0xbf9   :  { %v560_v37 = vpop.f32.mrb[4].mxu0 }
 0xbfa   :  { %v565_v38 = vrot.slane %v560_v37, 4  ;;  %v1105_v39 = vpop.f32.mrb[5].mxu0 }
 0xbfc   :  { %v567_v40 = vadd.f32 %v565_v38, %v1435_v15 }
 0xbfe   :  { %1231 = vtanh.f32 %v567_v40  ;;  %v1002_v42 = vmul.f32 -1.442695, %v567_v40 }
 0xc00   :  { %1233 = vpow2.f32 %v1002_v42 }
 0xc08   :  { %v1232_v41 = vpop.eup %1231 }
 0xc09   :  { %580 = vrot.lane.b32.xlu1 %v1232_v41, %s1342_s20 }
 0xc0a   :  { %v1234_v43 = vpop.eup %1233 }
 0xc0b   :  { %v571_v44 = vadd.f32 1.0, %v1234_v43 }
 0xc0d   :  { %1235 = vrcp.f32 %v571_v44 }
 0xc17   :  { %v1236_v45 = vpop.eup %1235 }
 0xc18   :  { %v578_v49 = vmul.f32 %v1236_v45, %v576_v48  ;;  %v1009_v48 = vld [vmem:[%s1550_s4] ss:$0 sm:$0xff]  ;;  %s1344_s4 = smov [#allocation6]  }
 0xc19   :  { %s969_s22 = sshll.u32 %s1344_s4, 4  ;;  %s970_s22 = int_to_ptr.vmem [resolvable:$true] %s969_s22 }
 0xc1a   :  { %s1285_s23 = scalar_lea.vmem %s970_s22, 128  ;;  %p1290_p9 = scmp.lt.s32.totalorder %s970_s22, %s970_s22 }
 0xc1b   :  { %p1286_p8 = scmp.ne.s32.totalorder %s970_s22, %s1285_s23  ;;  %p1291_p10 = scmp.lt.s32.totalorder %s1285_s23, %s1285_s23 }
 0xc1d   :  { %p1292_p11 = por %p1291_p10, %p1290_p9 }
 0xc1f   :  { %p1293_p12 = pnand %p1292_p11, %p1286_p8 }
 0xc7b   :  { %v581_v46 = vpop.permute.xlu1 %580 }
 0xc7c   :  { %v583_v47 = vmul.f32 %v1236_v45, %v581_v46 }
 0xc7e   :  { %585 = vrot.lane.b32.xlu0 %v583_v47, %s1342_s20 }
 0xcf0   :  { %v586_v50 = vpop.permute.xlu0 %585 }
 0xcf1   :  { %v588_v51 = vadd.f32 %v586_v50, %v578_v49 }
 0xcf3   :  { %1237 = vtanh.f32 %v588_v51 }
 0xcfd   :  { %v1238_v52 = vpop.eup %1237 }
 0xcfe   :  { %591 = vrot.lane.b32.xlu1 %v1238_v52, %s1342_s20 }
 0xd70   :  { %v592_v53 = vpop.permute.xlu1 %591 }
 0xd71   :  { %v594_v54 = vmul.f32 %v1236_v45, %v592_v53 }
 0xd73   :  { %v596_v55 = vrot.slane %v594_v54, 4  ;;  %v923_v56 = vsel %vm922_vm5, %v921_v35, %v594_v54 }
 0xd75   :  { %597 = vrot.lane.b32.xlu0 %v596_v55, %s1343_s1 }
 0xde7   :  { %v598_v57 = vpop.permute.xlu0 %597 }
 0xde8   :  { %1115 = vmatmul.mubr.msk.f32.vlgmr.msra.gmra.mrb[4].mxu1 %vm69_vm1, %v598_v57 }
 0xde9   :  { %1183 = vmatpush3.bf16.msra.mxu1 %v1407_v7  ;;  %1136 = vmatprep.mubr.msk.f32.mxu1 %vm1339_vm0, %v1340_v2 }
 0xdea   :  { %1184 = vmatprep.subr.bf16.mxu1 %v1338_v1  ;;  %v683_v1 = vrot.slane %v588_v51, 7 }
 0xded   :  { %1186 = vmatpush3.bf16.msra.mxu1 %v1413_v10 }
 0xebb   :  { %v667_v58 = vpop.f32.mrb[4].mxu1 }
 0xebc   :  { %v672_v59 = vrot.slane %v667_v58, 3  ;;  %v1116_v60 = vpop.f32.mrb[5].mxu1 }
 0xebe   :  { %v674_v61 = vadd.f32 %v672_v59, %v1435_v15 }
 0xec0   :  { %1239 = vtanh.f32 %v674_v61  ;;  %v1004_v63 = vmul.f32 -1.442695, %v674_v61 }
 0xec2   :  { %1241 = vpow2.f32 %v1004_v63 }
 0xeca   :  { %v1240_v62 = vpop.eup %1239 }
 0xecb   :  { %687 = vrot.lane.b32.xlu1 %v1240_v62, %s1342_s20 }
 0xecc   :  { %v1242_v0 = vpop.eup %1241 }
 0xecd   :  { %v678_v7 = vadd.f32 1.0, %v1242_v0 }
 0xecf   :  { %1243 = vrcp.f32 %v678_v7 }
 0xed9   :  { %v1244_v3 = vpop.eup %1243 }
 0xeda   :  { %v685_v10 = vmul.f32 %v1244_v3, %v683_v1 }
 0xf3d   :  { %v688_v2 = vpop.permute.xlu1 %687 }
 0xf3e   :  { %v690_v4 = vmul.f32 %v1244_v3, %v688_v2 }
 0xf40   :  { %692 = vrot.lane.b32.xlu0 %v690_v4, %s1342_s20 }
 0xfb2   :  { %v693_v5 = vpop.permute.xlu0 %692 }
 0xfb3   :  { %v695_v6 = vadd.f32 %v693_v5, %v685_v10 }
 0xfb5   :  { %1245 = vtanh.f32 %v695_v6  ;;  %v790_v27 = vrot.slane %v695_v6, 7 }
 0xfbf   :  { %v1246_v8 = vpop.eup %1245 }
 0xfc0   :  { %698 = vrot.lane.b32.xlu1 %v1246_v8, %s1342_s20 }
0x1032   :  { %v699_v9 = vpop.permute.xlu1 %698 }
0x1033   :  { %v701_v11 = vmul.f32 %v1244_v3, %v699_v9 }
0x1035   :  { %v703_v12 = vrot.slane %v701_v11, 5  ;;  %v925_v13 = vsel %vm924_vm6, %v923_v56, %v701_v11 }
0x1037   :  { %704 = vrot.lane.b32.xlu0 %v703_v12, %s1343_s1 }
0x10a9   :  { %v705_v14 = vpop.permute.xlu0 %704 }
0x10aa   :  { %1126 = vmatmul.mubr.msk.f32.vlgmr.msra.gmra.mrb[6].mxu0 %vm69_vm1, %v705_v14 }
0x117d   :  { %v774_v16 = vpop.f32.mrb[6].mxu0 }
0x117e   :  { %v779_v17 = vrot.slane %v774_v16, 2  ;;  %v1127_v18 = vpop.f32.mrb[7].mxu0 }
0x1180   :  { %v781_v19 = vadd.f32 %v779_v17, %v1435_v15 }
0x1182   :  { %1247 = vtanh.f32 %v781_v19  ;;  %v1006_v21 = vmul.f32 -1.442695, %v781_v19 }
0x1184   :  { %1249 = vpow2.f32 %v1006_v21 }
0x118c   :  { %v1248_v20 = vpop.eup %1247 }
0x118d   :  { %794 = vrot.lane.b32.xlu1 %v1248_v20, %s1342_s20 }
0x118e   :  { %v1250_v22 = vpop.eup %1249 }
0x118f   :  { %v785_v23 = vadd.f32 1.0, %v1250_v22 }
0x1191   :  { %1251 = vrcp.f32 %v785_v23 }
0x119b   :  { %v1252_v24 = vpop.eup %1251 }
0x119c   :  { %v792_v28 = vmul.f32 %v1252_v24, %v790_v27 }
0x11ff   :  { %v795_v25 = vpop.permute.xlu1 %794 }
0x1200   :  { %v797_v26 = vmul.f32 %v1252_v24, %v795_v25 }
0x1202   :  { %799 = vrot.lane.b32.xlu0 %v797_v26, %s1342_s20 }
0x1274   :  { %v800_v29 = vpop.permute.xlu0 %799 }
0x1275   :  { %v802_v30 = vadd.f32 %v800_v29, %v792_v28 }
0x1277   :  { %1253 = vtanh.f32 %v802_v30 }
0x1281   :  { %v1254_v31 = vpop.eup %1253 }
0x1282   :  { %805 = vrot.lane.b32.xlu1 %v1254_v31, %s1342_s20 }
0x12f4   :  { %v806_v32 = vpop.permute.xlu1 %805 }
0x12f5   :  { %v808_v33 = vmul.f32 %v1252_v24, %v806_v32 }
0x12f7   :  { %v810_v34 = vrot.slane %v808_v33, 6  ;;  %v927_v35 = vsel %vm926_vm7, %v925_v13, %v808_v33 }
0x12f9   :  { %811 = vrot.lane.b32.xlu0 %v810_v34, %s1343_s1 }
0x136b   :  { %v812_v36 = vpop.permute.xlu0 %811 }
0x136c   :  { %1137 = vmatmul.mubr.msk.f32.vlgmr.msra.gmra.mrb[6].mxu1 %vm69_vm1, %v812_v36 }
0x143f   :  { %v881_v37 = vpop.f32.mrb[6].mxu1 }
0x1440   :  { %v886_v38 = vrot.slane %v881_v37, 1  ;;  %v1138_v39 = vpop.f32.mrb[7].mxu1 }
0x1442   :  { %v888_v40 = vadd.f32 %v886_v38, %v1435_v15  ;;  %v897_v15 = vrot.slane %v802_v30, 7 }
0x1444   :  { %1255 = vtanh.f32 %v888_v40  ;;  %v1008_v42 = vmul.f32 -1.442695, %v888_v40 }
0x1446   :  { %1257 = vpow2.f32 %v1008_v42 }
0x144e   :  { %v1256_v41 = vpop.eup %1255 }
0x144f   :  { %901 = vrot.lane.b32.xlu1 %v1256_v41, %s1342_s20 }
0x1450   :  { %v1258_v43 = vpop.eup %1257 }
0x1451   :  { %v892_v44 = vadd.f32 1.0, %v1258_v43 }
0x1453   :  { %1259 = vrcp.f32 %v892_v44 }
0x145d   :  { %v1260_v45 = vpop.eup %1259 }
0x145e   :  { %v899_v49 = vmul.f32 %v1260_v45, %v897_v15 }
0x14c1   :  { %v902_v46 = vpop.permute.xlu1 %901 }
0x14c2   :  { %v904_v47 = vmul.f32 %v1260_v45, %v902_v46 }
0x14c4   :  { %906 = vrot.lane.b32.xlu0 %v904_v47, %s1342_s20 }
0x14c8   :  { %941 = vrot.lane.b32.xlu0 %v1009_v48, %s1343_s1 }
0x1536   :  { %v907_v50 = vpop.permute.xlu0 %906 }
0x1537   :  { %v909_v51 = vadd.f32 %v907_v50, %v899_v49 }
0x1539   :  { %1261 = vtanh.f32 %v909_v51 }
0x153a   :  { %v942_v54 = vpop.permute.xlu0 %941 }
0x1543   :  { %v1262_v52 = vpop.eup %1261 }
0x1544   :  { %912 = vrot.lane.b32.xlu1 %v1262_v52, %s1342_s20 }
0x15b6   :  { %v913_v53 = vpop.permute.xlu1 %912 }
0x15b7   :  { %v915_v55 = vmul.f32 %v1260_v45, %v913_v53 }
0x15b9   :  { %v944_v56 = vmul.f32 %v942_v54, %v915_v55  ;;  %v929_v57 = vsel %vm928_vm8, %v927_v35, %v915_v55 }
0x15bb   :  { %946 = vrot.lane.b32.xlu1 %v944_v56, %s1343_s1 }
0x15bf   :  { %931 = vrot.lane.b32.xlu1 %v929_v57, %s1343_s1 }
0x162d   :  { %v947_v58 = vpop.permute.xlu1 %946 }
0x162e   :  { %v950_v59 = vsel %vm949_vm9, %v947_v58, 0.0 }
0x162f   :  { %951 = vadd.xlane.f32.xlu0 %v950_v59 }
0x1631   :  { %v932_v60 = vpop.permute.xlu1 %931 }
0x1632   :  { %934 = vst.msk [vmem:[#allocation6] sm:$0xff] %vm69_vm1, %v932_v60 }
0x1633   :  { %1296 = shalt.err (!%p1293_p12)
}
0x1634   :  { %s1297_s26 = scalar_lea.hbm %s1552_s6, 128 }
0x1635   :  { %p1298_p13 = scmp.ne.s32.totalorder %s1552_s6, %s1297_s26  ;;  %p1301_p0 = scmp.lt.u32.totalorder %s1297_s26, %s1552_s6 }
0x1637   :  { %p1303_p1 = pnand %p1301_p0, %p1298_p13 }
0x1639   :  { %1306 = shalt.err (!%p1303_p1)
}
0x163a   :  { %972 = dma.vmem_to_hbm [thread:$0]  %s970_s22, 128, %s1552_s6, [#allocation5]   ;;  %v1010_v61 = vld [vmem:[#allocation2] ss:$0 sm:$0xff]  ;;  %vm961_vm10 = vcmask 7175  }
0x163b   :  { %s1345_s10 = smov [#allocation7]  }
0x163c   :  { %s979_s11 = sshll.u32 %s1345_s10, 4  ;;  %s980_s11 = int_to_ptr.vmem [resolvable:$true] %s979_s11 }
0x163d   :  { %s1307_s5 = scalar_lea.vmem %s980_s11, 16  ;;  %s1311_s12 = scalar_lea.vmem %s980_s11, 32 }
0x163e   :  { %p1308_p2 = scmp.ne.s32.totalorder %s980_s11, %s1307_s5  ;;  %p1312_p3 = scmp.lt.s32.totalorder %s980_s11, %s980_s11 }
0x163f   :  { %p1313_p4 = scmp.lt.s32.totalorder %s1311_s12, %s1307_s5 }
0x1641   :  { %p1314_p5 = por %p1313_p4, %p1312_p3 }
0x1643   :  { %p1315_p6 = pnand %p1314_p5, %p1308_p2 }
0x16bc   :  { %v952_v62 = vpop.xlane.xlu0 %951 }
0x16bd   :  { %v960_v63 = vadd.f32 %v1010_v61, %v952_v62 }
0x16bf   :  { %962 = vst.msk [vmem:[#allocation7 - $0x7] sm:$0x80] %vm961_vm10, %v960_v63 }
0x16c0   :  { %1318 = shalt.err (!%p1315_p6)
}
0x16c1   :  { %s1319_s6 = scalar_lea.hbm %s1553_s7, 16 }
0x16c2   :  { %p1320_p7 = scmp.ne.s32.totalorder %s1553_s7, %s1319_s6  ;;  %p1323_p8 = scmp.lt.u32.totalorder %s1319_s6, %s1553_s7 }
0x16c4   :  { %p1325_p9 = pnand %p1323_p8, %p1320_p7 }
0x16c6   :  { %1328 = shalt.err (!%p1325_p9)
}
0x16c7   :  { %982 = dma.vmem_to_hbm [thread:$0]  %s980_s11, 16, %s1553_s7, [#allocation8]  }
0x16c8   :  { %1331 = dma.done.wait [#allocation5], 128  }
0x16c9   :  { %1332 = vsyncadd [#allocation5], 4294967168 }
0x16ca   :  { %1333 = dma.done.wait [#allocation8], 16  }
0x16cb   :  { %1334 = vsyncadd [#allocation8], 4294967280 }
0x16cc   :  { %989 = vsyncpa [#allocation4], 1 }
0x16cd   :  { %990 = vsyncpa [#allocation5], 1 }
0x16ce   :  { %991 = vsyncpa [#allocation8], 1 }

</bundles_post_ra>
